<compile_context>
chip_gen: v5e
topology: v5e:2x2
jax: 0.10.0
libtpu: 0.0.40
codegen_flags: <defaults>
</compile_context>

<pallas_src>
import functools

import jax
import jax.numpy as jnp
from jax import lax
from jax.experimental import pallas as pl
from jax.experimental.pallas import tpu as pltpu


def _round_up(x, m):
    return (x + m - 1) // m * m


def _contrastive_kernel(im_ref, s_ref, out_ref, acc_ref, *, margin, valid_b):
    """Grid axis 0 tiles the embedding (contraction) dim."""
    k = pl.program_id(0)

    @pl.when(k == 0)
    def _():
        acc_ref[...] = jnp.zeros_like(acc_ref)

    # scores[i, j] += <im_i, s_j> over this K tile.  Contraction over the last
    # dim of both operands (no explicit transpose); f32 accumulation on the MXU.
    acc_ref[...] += lax.dot_general(
        im_ref[...], s_ref[...],
        dimension_numbers=(((1,), (1,)), ((), ())),
        preferred_element_type=jnp.float32)

    @pl.when(k == pl.num_programs(0) - 1)
    def _():
        scores = acc_ref[...]                                    # (Bp, Bp) f32
        Bp = scores.shape[0]

        row = lax.broadcasted_iota(jnp.int32, (Bp, Bp), 0)
        col = lax.broadcasted_iota(jnp.int32, (Bp, Bp), 1)
        eye = row == col

        # Diagonal extracted once (masked row-sum); indexes both cost terms.
        diag = jnp.sum(jnp.where(eye, scores, 0.0), axis=1)      # (Bp,)

        # Single fused mask: diagonal + padded rows/cols -> -inf.  Because the
        # hinge clamps at 0, this is equivalent to PyTorch's post-hinge
        # masked_fill_(I, 0).
        invalid = eye | (row >= valid_b) | (col >= valid_b)
        scores_m = jnp.where(invalid, -jnp.inf, scores)

        # Reduce first, hinge after (max / constant-shift / clamp commute):
        # avoids materializing full (Bp, Bp) cost_s / cost_im matrices.
        row_max = jnp.max(scores_m, axis=1)                      # (Bp,)
        col_max = jnp.max(scores_m, axis=0)                      # (Bp,)
        cost_s = jnp.maximum(margin + row_max - diag, 0.0)       # hardest caption
        cost_im = jnp.maximum(margin + col_max - diag, 0.0)      # hardest image

        out_ref[...] = (cost_s + cost_im).reshape(1, Bp)


def contrastive_loss(im, s, *, margin=0.0, tk_max=512):
    """Pallas ContrastiveLoss(margin, measure='cosine', max_violation=True)."""
    B, D = im.shape
    assert s.shape == (B, D)

    # Pad batch to a sublane multiple; tile D (pad to a tile multiple) when it
    # is larger than one tile.  Padded rows/cols are masked inside the kernel.
    Bp = max(_round_up(B, 8), 8)
    if D <= tk_max:
        tk, Dp = D, D
    else:
        tk = tk_max
        Dp = _round_up(D, tk)

    def _pad(x):
        if (Bp, Dp) == (B, D):
            return x
        return jnp.pad(x, ((0, Bp - B), (0, Dp - D)))

    im_p, s_p = _pad(im), _pad(s)
    nk = Dp // tk

    itemsize = jnp.dtype(im_p.dtype).itemsize
    # Double-buffered (Bp, tk) blocks for both inputs + f32 scores scratch.
    vmem_need = 2 * 2 * Bp * tk * itemsize + Bp * Bp * 4 + Bp * 4
    vmem_limit = int(min(max(2 * vmem_need, 16 << 20), 60 << 20))

    out = pl.pallas_call(
        functools.partial(_contrastive_kernel,
                          margin=float(margin), valid_b=B),
        out_shape=jax.ShapeDtypeStruct((1, Bp), jnp.float32),
        grid=(nk,),
        in_specs=[
            pl.BlockSpec((Bp, tk), lambda k: (0, k)),
            pl.BlockSpec((Bp, tk), lambda k: (0, k)),
        ],
        out_specs=pl.BlockSpec((1, Bp), lambda k: (0, 0)),
        scratch_shapes=[pltpu.VMEM((Bp, Bp), jnp.float32)],
        compiler_params=pltpu.CompilerParams(
            dimension_semantics=("arbitrary",),
            vmem_limit_bytes=vmem_limit),
        cost_estimate=pl.CostEstimate(
            flops=2 * Bp * Bp * Dp,
            transcendentals=0,
            bytes_accessed=2 * Bp * Dp * itemsize + Bp * 4),
    )(im_p, s_p)
    return out[0, :B]


def _reference(im, s, margin=0.0):
    """Pure-JAX reference mirroring the PyTorch forward."""
    scores = jnp.matmul(im, s.T, precision=jax.lax.Precision.HIGHEST)
    diag = jnp.diag(scores).reshape(-1, 1)
    cost_s = jnp.maximum(margin + scores - diag, 0.0)
    cost_im = jnp.maximum(margin + scores - diag.T, 0.0)
    eye = jnp.eye(scores.shape[0], dtype=bool)
    cost_s = jnp.where(eye, 0.0, cost_s)
    cost_im = jnp.where(eye, 0.0, cost_im)
    return jnp.max(cost_s, axis=1) + jnp.max(cost_im, axis=0)


if __name__ == "__main__":
    key = jax.random.PRNGKey(0)

    # --- small shape, single K step (matches module-scale example) ---
    B, D = 8, 32
    k_im, k_s, key = jax.random.split(key, 3)
    im = jax.random.normal(k_im, (B, D), dtype=jnp.float32)
    s = jax.random.normal(k_s, (B, D), dtype=jnp.float32)

    out = jax.block_until_ready(contrastive_loss(im, s, margin=0.0))
    ref = _reference(im, s, margin=0.0)
    assert out.shape == (B,)
    assert jnp.allclose(out, ref, atol=1e-5, rtol=1e-5), (out, ref)

    # --- larger shape: exercises D tiling (nk=3) and batch/D padding+masking ---
    B2, D2 = 20, 1280
    k_im2, k_s2, _ = jax.random.split(key, 3)
    im2 = jax.random.normal(k_im2, (B2, D2), dtype=jnp.float32)
    s2 = jax.random.normal(k_s2, (B2, D2), dtype=jnp.float32)

    out2 = jax.block_until_ready(contrastive_loss(im2, s2, margin=0.2))
    ref2 = _reference(im2, s2, margin=0.2)
    assert out2.shape == (B2,)
    assert jnp.allclose(out2, ref2, atol=1e-3, rtol=1e-3), (out2, ref2)

    print("KERNEL_OK")
</pallas_src>

<mosaic_0001>
module attributes {stable_mosaic.version = 11 : i64} {
  func.func @_contrastive_kernel(%arg0: i32, %arg1: memref<8x32xf32, #tpu.memory_space<vmem>>, %arg2: memref<8x32xf32, #tpu.memory_space<vmem>>, %arg3: memref<1x8xf32, #tpu.memory_space<vmem>>, %arg4: memref<8x8xf32, #tpu.memory_space<vmem>>) attributes {dimension_semantics = [#tpu.dimension_semantics<arbitrary>], iteration_bounds = array<i64: 1>, scalar_prefetch = 0 : i64, scratch_operands = 1 : i64, tpu.core_type = #tpu.core_type<tc>, window_params = [{transform_indices = @transform_0, window_bounds = array<i64: 8, 32>}, {transform_indices = @transform_1, window_bounds = array<i64: 8, 32>}, {pipeline_mode = #tpu.pipeline_mode<synchronous>, transform_indices = @transform_2, window_bounds = array<i64: 1, 8>}]} {
    %c0_i32 = arith.constant 0 : i32
    %0 = arith.cmpi eq, %arg0, %c0_i32 : i32
    %1 = arith.extui %0 : i1 to i32
    %c0_i32_0 = arith.constant 0 : i32
    %2 = arith.cmpi ne, %1, %c0_i32_0 : i32
    scf.if %2 {
      %cst_10 = arith.constant 0.000000e+00 : f32
      %12 = vector.broadcast %cst_10 : f32 to vector<8x8xf32>
      %c0_11 = arith.constant 0 : index
      %c0_12 = arith.constant 0 : index
      %13 = vector.load %arg4[%c0_11, %c0_12] : memref<8x8xf32, #tpu.memory_space<vmem>>, vector<8x8xf32>
      tpu.vector_store %arg4[%c0_11, %c0_12], %12 {strides = array<i32>} : memref<8x8xf32, #tpu.memory_space<vmem>>, vector<8x8xf32>,
    } else {
    }
    %c0 = arith.constant 0 : index
    %c0_1 = arith.constant 0 : index
    %3 = vector.load %arg4[%c0, %c0_1] : memref<8x8xf32, #tpu.memory_space<vmem>>, vector<8x8xf32>
    %c0_2 = arith.constant 0 : index
    %c0_3 = arith.constant 0 : index
    %4 = vector.load %arg1[%c0_2, %c0_3] : memref<8x32xf32, #tpu.memory_space<vmem>>, vector<8x32xf32>
    %c0_4 = arith.constant 0 : index
    %c0_5 = arith.constant 0 : index
    %5 = vector.load %arg2[%c0_4, %c0_5] : memref<8x32xf32, #tpu.memory_space<vmem>>, vector<8x32xf32>
    %cst = arith.constant dense<0.000000e+00> : vector<8x8xf32>
    %6 = tpu.matmul %4, %5, %cst {dimension_numbers = #tpu.dot_dimension_numbers<[1], [1], [0], [0], [0, 0, 1, 0], [], []>} : vector<8x32xf32>, vector<8x32xf32>, vector<8x8xf32> -> vector<8x8xf32>
    %7 = arith.addf %3, %6 : vector<8x8xf32>
    %c0_6 = arith.constant 0 : index
    %c0_7 = arith.constant 0 : index
    %8 = vector.load %arg4[%c0_6, %c0_7] : memref<8x8xf32, #tpu.memory_space<vmem>>, vector<8x8xf32>
    tpu.vector_store %arg4[%c0_6, %c0_7], %7 {strides = array<i32>} : memref<8x8xf32, #tpu.memory_space<vmem>>, vector<8x8xf32>,
    %c0_i32_8 = arith.constant 0 : i32
    %9 = arith.cmpi eq, %arg0, %c0_i32_8 : i32
    %10 = arith.extui %9 : i1 to i32
    %c0_i32_9 = arith.constant 0 : i32
    %11 = arith.cmpi ne, %10, %c0_i32_9 : i32
    scf.if %11 {
      %c0_10 = arith.constant 0 : index
      %c0_11 = arith.constant 0 : index
      %12 = vector.load %arg4[%c0_10, %c0_11] : memref<8x8xf32, #tpu.memory_space<vmem>>, vector<8x8xf32>
      %13 = tpu.iota {dimensions = array<i32: 0>} : vector<8x8xi32>
      %14 = tpu.iota {dimensions = array<i32: 1>} : vector<8x8xi32>
      %15 = arith.cmpi eq, %13, %14 : vector<8x8xi32>
      %cst_12 = arith.constant 0.000000e+00 : f32
      %16 = vector.broadcast %cst_12 : f32 to vector<8x8xf32>
      %17 = arith.select %15, %12, %16 : vector<8x8xi1>, vector<8x8xf32>
      %cst_13 = arith.constant dense<0.000000e+00> : vector<8xf32>
      %18 = vector.multi_reduction <add>, %17, %cst_13 [1] : vector<8x8xf32> to vector<8xf32>
      %c8_i32 = arith.constant 8 : i32
      %19 = vector.broadcast %c8_i32 : i32 to vector<8x8xi32>
      %20 = arith.cmpi sge, %13, %19 : vector<8x8xi32>
      %21 = arith.ori %15, %20 : vector<8x8xi1>
      %c8_i32_14 = arith.constant 8 : i32
      %22 = vector.broadcast %c8_i32_14 : i32 to vector<8x8xi32>
      %23 = arith.cmpi sge, %14, %22 : vector<8x8xi32>
      %24 = arith.ori %21, %23 : vector<8x8xi1>
      %cst_15 = arith.constant 0xFF800000 : f32
      %25 = vector.broadcast %cst_15 : f32 to vector<8x8xf32>
      %26 = arith.select %24, %25, %12 : vector<8x8xi1>, vector<8x8xf32>
      %cst_16 = arith.constant dense<0xFF800000> : vector<8xf32>
      %27 = vector.multi_reduction <maximumf>, %26, %cst_16 [1] : vector<8x8xf32> to vector<8xf32>
      %cst_17 = arith.constant dense<0xFF800000> : vector<8xf32>
      %28 = vector.multi_reduction <maximumf>, %26, %cst_17 [0] : vector<8x8xf32> to vector<8xf32>
      %cst_18 = arith.constant 0.000000e+00 : f32
      %29 = vector.broadcast %cst_18 : f32 to vector<8xf32>
      %30 = arith.addf %29, %27 : vector<8xf32>
      %31 = arith.subf %30, %18 : vector<8xf32>
      %cst_19 = arith.constant 0.000000e+00 : f32
      %32 = vector.broadcast %cst_19 : f32 to vector<8xf32>
      %33 = arith.maximumf %31, %32 : vector<8xf32>
      %cst_20 = arith.constant 0.000000e+00 : f32
      %34 = vector.broadcast %cst_20 : f32 to vector<8xf32>
      %35 = arith.addf %34, %28 : vector<8xf32>
      %36 = arith.subf %35, %18 : vector<8xf32>
      %cst_21 = arith.constant 0.000000e+00 : f32
      %37 = vector.broadcast %cst_21 : f32 to vector<8xf32>
      %38 = arith.maximumf %36, %37 : vector<8xf32>
      %39 = arith.addf %33, %38 : vector<8xf32>
      %40 = vector.shape_cast %39 : vector<8xf32> to vector<1x8xf32>
      %c0_22 = arith.constant 0 : index
      %c0_23 = arith.constant 0 : index
      %41 = vector.load %arg3[%c0_22, %c0_23] : memref<1x8xf32, #tpu.memory_space<vmem>>, vector<1x8xf32>
      tpu.vector_store %arg3[%c0_22, %c0_23], %40 {strides = array<i32>} : memref<1x8xf32, #tpu.memory_space<vmem>>, vector<1x8xf32>,
    } else {
    }
    return
  }
  func.func @transform_0(%arg0: i32) -> (i32, i32) {
    %c0_i32 = arith.constant 0 : i32
    %c0_i32_0 = arith.constant 0 : i32
    return %c0_i32, %arg0 : i32, i32
  }
  func.func @transform_1(%arg0: i32) -> (i32, i32) {
    %c0_i32 = arith.constant 0 : i32
    %c0_i32_0 = arith.constant 0 : i32
    return %c0_i32, %arg0 : i32, i32
  }
  func.func @transform_2(%arg0: i32) -> (i32, i32) {
    %c0_i32 = arith.constant 0 : i32
    %c0_i32_0 = arith.constant 0 : i32
    %c0_i32_1 = arith.constant 0 : i32
    return %c0_i32, %c0_i32_0 : i32, i32
  }
}

</mosaic_0001>

<bundles_post_ra>
// kernel: tpu_custom_call.1
= control target key start
LH: loop header
LB: loop body
LE: loop exit
PB: predicated region body
PF: predicated region fallthrough
CT: control target
= control target key end

     0   :  { %7 = vsyncpa [#allocation4], 0  ;;  %s272_s0 = inlined_call_operand.hbm [shape: f32[8,32], index: 0, kind: input, shape index: {}]   ;;  %s273_s1 = inlined_call_operand.hbm [shape: f32[8,32], index: 1, kind: input, shape index: {}]   ;;  %s274_s2 = inlined_call_operand.hbm [shape: f32[1,8], index: 2, kind: output, shape index: {}]  }
   0x1   :  { %8 = vsyncpa [#allocation7], 0 }
   0x2   :  { %9 = vsyncpa [#allocation5], 0  ;;  %s15_s11 = sshll.u32 %s272_s0, 4  ;;  %s239_s12 = smov [#allocation3]   ;;  %s16_s11 = int_to_ptr.hbm [resolvable:$true] %s15_s11 }
   0x3   :  { %s17_s13 = sshll.u32 %s239_s12, 4  ;;  %s26_s16 = sshll.u32 %s273_s1, 4  ;;  %s18_s13 = int_to_ptr.vmem [resolvable:$true] %s17_s13  ;;  %s27_s16 = int_to_ptr.hbm [resolvable:$true] %s26_s16 }
   0x4   :  { %20 = dma.hbm_to_vmem [thread:$0]  %s16_s11, 128, %s18_s13, [#allocation4]  }
   0x5   :  { %s240_s17 = smov [#allocation6]  }
   0x6   :  { %s28_s18 = sshll.u32 %s240_s17, 4  ;;  %s29_s18 = int_to_ptr.vmem [resolvable:$true] %s28_s18 }
   0x7   :  { %31 = dma.hbm_to_vmem [thread:$0]  %s27_s16, 128, %s29_s18, [#allocation7]  }
   0x8   :  { %233 = dma.done.wait [#allocation4], 128  }
   0x9   :  { %234 = vsyncadd [#allocation4], 4294967168 }
   0xa   :  { %235 = dma.done.wait [#allocation7], 128  }
   0xb   :  { %236 = vsyncadd [#allocation7], 4294967168  ;;  %vm44_vm0 = vcmask 64512   ;;  %v241_v0 = vmov 0.0   ;;  %vm49_vm1 = vcmask 261120   ;;  %v48_v1 = vld [vmem:[#allocation6] sm:$0xff]  ;;  %v83_v3 = vlaneseq }
   0xc   :  { %45 = vst.msk [vmem:[#allocation2] sm:$0xff] %vm44_vm0, %v241_v0  ;;  %151 = vmatpush.xpose.msk.msra.mxu0 %vm49_vm1, %v48_v1  ;;  %v47_v2 = vld [vmem:[#allocation3] sm:$0xff]  ;;  %v242_v25 = vmov 0   ;;  %s243_s0 = smov [#allocation8]   ;;  %s140_s21 = sshll.u32 %s274_s2, 4  ;;  %vm131_vm5 = vcmask 57344   ;;  %s141_s21 = int_to_ptr.hbm [resolvable:$true] %s140_s21 }
   0xd   :  { %v84_v4 = vshrl.u32 %v83_v3, 7  ;;  %v86_v8 = vand.u32 127, %v83_v3  ;;  %160 = vset.pattern.permute.xlu0 %v242_v25  ;;  %s138_s1 = sshll.u32 %s243_s0, 4  ;;  %s139_s1 = int_to_ptr.vmem [resolvable:$true] %s138_s1 }
   0xf   :  { %152 = vmatmul.msk.f32.vlgmr.msra.gmra.mxu0 %vm49_vm1, %v47_v2  ;;  %158 = vset.pattern.permute.xlu1 %v84_v4  ;;  %vm87_vm2 = vcmp.eq.s32.totalorder %v84_v4, %v86_v8  ;;  %vm94_vm3 = vcmp.ge.s32.totalorder %v86_v8, 8 }
  0x10   :  { %vm95_vm4 = vmor %vm87_vm2, %vm94_vm3 }
  0x13   :  { %v46_v5 = vld [vmem:[#allocation2] sm:$0xff] }
  0x8c   :  { %v73_v6 = vpop.f32.mrf.mxu0 }
  0x8d   :  { %v76_v7 = vadd.f32 %v73_v6, %v46_v5 }
  0x8f   :  { %78 = vst.msk [vmem:[#allocation2] sm:$0xff] %vm44_vm0, %v76_v7 }
  0x96   :  { %v82_v9 = vld [vmem:[#allocation2] sm:$0xff] }
  0x97   :  { %v88_v10 = vsel %vm87_vm2, %v82_v9, 0.0  ;;  %v96_v12 = vsel %vm95_vm4, -inf, %v82_v9 }
  0x98   :  { %v89_v11 = vsel %vm44_vm0, %v88_v10, 0.0  ;;  %v97_v13 = vsel %vm44_vm0, %v96_v12, -inf }
  0x99   :  { %90 = vadd.xlane.f32.xlu0 %v89_v11  ;;  %v100_v14 = vrot.slane %v97_v13, 4 }
  0x9b   :  { %v101_v15 = vmax.f32 %v97_v13, %v100_v14 }
  0x9d   :  { %v102_v16 = vrot.slane %v101_v15, 2 }
  0x9f   :  { %v103_v17 = vmax.f32 %v101_v15, %v102_v16 }
  0xa1   :  { %98 = vmax.xlane.f32.xlu0 %v97_v13  ;;  %v104_v18 = vrot.slane %v103_v17, 1 }
  0xa3   :  { %v105_v21 = vmax.f32 %v103_v17, %v104_v18 }
 0x10c   :  { %v91_v19 = vpop.xlane.xlu0 %90 }
 0x10d   :  { %v111_v20 = vperm.slane %v91_v19, %v86_v8 }
 0x10f   :  { %v113_v22 = vsub.f32 %v105_v21, %v111_v20 }
 0x111   :  { %v114_v23 = vmax.f32 %v113_v22, 0.0 }
 0x113   :  { %v116_v24 = vperm.slane %v114_v23, 0 }
 0x114   :  { %v99_v26 = vpop.xlane.xlu0 %98 }
 0x115   :  { %121 = vperm.xlu1 %158, %v116_v24   ;;  %v107_v27 = vsub.f32 %v99_v26, %v91_v19 }
 0x117   :  { %v108_v28 = vmax.f32 %v107_v27, 0.0 }
 0x11d   :  { %159 = vset.pattern.permute.xlu1 %v242_v25 }
 0x187   :  { %v122_v29 = vpop.permute.xlu1 %121 }
 0x188   :  { %v124_v30 = vadd.f32 %v122_v29, %v108_v28 }
 0x18a   :  { %127 = vperm.xlu1 %159, %v124_v30  }
 0x1fc   :  { %v128_v31 = vpop.permute.xlu1 %127 }
 0x1fd   :  { %v129_v32 = vperm.slane %v128_v31, %v86_v8 }
 0x1ff   :  { %132 = vst.msk [vmem:[#allocation8] sm:$0x1] %vm131_vm5, %v129_v32 }
 0x200   :  { %143 = dma.vmem_to_hbm [thread:$0]  %s139_s1, 16, %s141_s21, [#allocation5]  }
 0x201   :  { %237 = dma.done.wait [#allocation5], 16  }
 0x202   :  { %238 = vsyncadd [#allocation5], 4294967280 }
 0x203   :  { %148 = vsyncpa [#allocation4], 1 }
 0x204   :  { %149 = vsyncpa [#allocation7], 1 }
 0x205   :  { %150 = vsyncpa [#allocation5], 1 }

</bundles_post_ra>
